<compile_context>
chip_gen: v6e
topology: v6e:2x2x1
jax: 0.10.0
libtpu: 0.0.40
codegen_flags: <defaults>
</compile_context>

<pallas_src>
import jax
import jax.numpy as jnp
from jax.experimental import pallas as pl
from jax.experimental.pallas import tpu as pltpu


def _wavelet_kernel(x_ref, coef_ref, y_ref):
    """Fused Haar -> filter -> inverse-Haar on one row-pair tile.

    x_ref / y_ref : (TH, 2*W).  Per merged row r: lanes [0, W) hold image row 2r
                    (natural column order) and lanes [W, 2W) hold image row 2r+1.
    coef_ref      : (TH, 3*W) f32, contiguous lane-duplicated planes [A | B | C].
    """
    w2 = x_ref.shape[-1]
    w = w2 // 2

    e = x_ref[:, :w].astype(jnp.float32)   # image rows 2r
    o = x_ref[:, w:].astype(jnp.float32)   # image rows 2r+1

    # Lane-parity mask from a (1, w) iota; broadcast along sublanes is cheap.
    lane = jax.lax.broadcasted_iota(jnp.int32, (1, w), 1)
    is_even_lane = (lane & 1) == 0

    def partner(z):
        # partner(z)[..., k] = z[..., k ^ 1]  (swap within each column pair).
        nxt = pltpu.roll(z, w - 1, 1)       # z[..., (k + 1) % w]
        prv = pltpu.roll(z, 1, 1)           # z[..., (k - 1) % w]
        return jnp.where(is_even_lane, nxt, prv)

    pe = partner(e)                         # swaps x00 <-> x01 within each pair
    po = partner(o)                         # swaps x10 <-> x11

    a_c = coef_ref[:, :w]
    b_c = coef_ref[:, w:2 * w]
    c_c = coef_ref[:, 2 * w:]
    d_c = 1.0 - a_c - b_c - c_c             # A + B + C + D == 1 exactly

    # Even output rows (image row 2r):   lane 2j -> a,  lane 2j+1 -> b
    y_ref[:, :w] = (a_c * e + b_c * pe + c_c * o + d_c * po).astype(y_ref.dtype)
    # Odd output rows (image row 2r+1):  lane 2j -> c,  lane 2j+1 -> d
    y_ref[:, w:] = (d_c * e + c_c * pe + b_c * o + a_c * po).astype(y_ref.dtype)


def precompute_wavelet_coef(filt):
    """filt (3, h/2, w/2) -> (h/2, 3*w) f32: contiguous lane-dup [A | B | C] planes.

    Call this once (outside the hot loop) if the filter is frozen, and pass the
    result via wavelet_filter_net(..., coef=...) to skip per-call materialization.
    """
    f = filt.astype(jnp.float32)
    f0, f1, f2 = f[0], f[1], f[2]
    ca = 0.25 * (1.0 + f0 + f1 + f2)   # weight of x[2i  , 2j  ] for out[2i, 2j]
    cb = 0.25 * (1.0 - f0 + f1 - f2)   # weight of x[2i  , 2j+1] for out[2i, 2j]
    cc = 0.25 * (1.0 - f0 - f1 + f2)   # weight of x[2i+1, 2j  ] for out[2i, 2j]
    dup = lambda p: jnp.repeat(p, 2, axis=-1)          # (h/2, w/2) -> (h/2, w)
    return jnp.concatenate([dup(ca), dup(cb), dup(cc)], axis=-1)   # (h/2, 3*w)


def _choose_row_tile(hh, w2, n, *, itemsize=4, target_bytes=4 << 20, min_steps=8):
    """Rows of the h/2 grid per step: multiple of 8 (or the full extent), sized for
    ~target_bytes per x tile, and capped so the grid has >= min_steps steps when the
    image is big enough.  Never exceeds the byte cap (no unbounded fallback)."""
    bytes_per_row = max(w2 * itemsize, 1)
    cap = max(8, (target_bytes // bytes_per_row) // 8 * 8)        # hard byte cap
    want_tiles = -(-min_steps // max(n, 1))                       # ceil(min_steps/n)
    want_tiles = min(want_tiles, max(1, hh // 8))                 # feasible with >=8-row tiles
    if want_tiles > 1:
        cap = min(cap, max(8, (hh // want_tiles) // 8 * 8))       # keep enough grid steps
    if cap >= hh:
        return hh                                                 # tiny image: full extent
    th = cap
    while th >= 8:                       # prefer an exact divisor (no masked edge block)
        if hh % th == 0:
            return th
        th -= 8
    return cap                           # cdiv grid; Pallas masks the partial edge block


def wavelet_filter_net(x, filt, *, coef=None, target_tile_bytes=4 << 20,
                       io_dtype=jnp.float32):
    """x: (b, c, h, w) with c == 1; filt: (3, h//2, w//2).

    io_dtype=jnp.bfloat16 halves image HBM traffic (compute stays f32) but breaks
    1e-5 parity with the f32 PyTorch graph — opt-in only.
    """
    b, c, h, w = x.shape
    assert c == 1, "WaveletFilterNet's filter broadcast only supports c == 1"
    assert h % 2 == 0 and w % 2 == 0, "h and w must be even"
    hh, w2 = h // 2, 2 * w
    n = b * c

    if coef is None:
        coef = precompute_wavelet_coef(filt)
    coef = coef.astype(jnp.float32)

    # Zero-copy view: merge each image row pair into one lane-dense row:
    #   xm[i, r, 0:w] = x[i, 2r, :],   xm[i, r, w:2w] = x[i, 2r+1, :]
    xm = x.astype(io_dtype).reshape(n, hh, w2)

    th = _choose_row_tile(hh, w2, n, itemsize=jnp.dtype(io_dtype).itemsize,
                          target_bytes=target_tile_bytes)
    # Row tiles outer, batch inner: the coef block index is constant across the
    # inner batch axis, so its DMA is only issued when the row tile changes.
    grid = (pl.cdiv(hh, th), n)

    x_spec = pl.BlockSpec((None, th, w2), lambda r, i: (i, r, 0))
    coef_spec = pl.BlockSpec((th, 3 * w), lambda r, i: (r, 0))
    y_spec = pl.BlockSpec((None, th, w2), lambda r, i: (i, r, 0))

    ym = pl.pallas_call(
        _wavelet_kernel,
        out_shape=jax.ShapeDtypeStruct((n, hh, w2), io_dtype),
        grid=grid,
        in_specs=[x_spec, coef_spec],
        out_specs=y_spec,
        compiler_params=pltpu.CompilerParams(
            dimension_semantics=("parallel", "parallel"),
            vmem_limit_bytes=48 * 1024 * 1024,   # safe under v7x's 64 MiB physical VMEM
        ),
    )(xm, coef)

    # Zero-copy view back to NCHW.
    return ym.reshape(b, c, h, w)


def _reference(x, filt):
    """Pure-JAX reference reproducing the PyTorch forward pass."""
    b, c, h, w = x.shape
    xb = x.reshape(b * c, h // 2, 2, w // 2, 2)
    x00, x01 = xb[:, :, 0, :, 0], xb[:, :, 0, :, 1]
    x10, x11 = xb[:, :, 1, :, 0], xb[:, :, 1, :, 1]
    LL = 0.5 * (x00 + x01 + x10 + x11)
    LH = 0.5 * (x00 - x01 + x10 - x11)
    HL = 0.5 * (x00 + x01 - x10 - x11)
    HH = 0.5 * (x00 - x01 - x10 + x11)
    f_lh, f_hl, f_hh = HH * filt[0], HL * filt[1], LH * filt[2]
    a = (LL + f_lh + f_hl + f_hh) * 0.5
    bb = (LL - f_lh + f_hl - f_hh) * 0.5
    cc = (LL + f_lh - f_hl - f_hh) * 0.5
    dd = (LL - f_lh - f_hl + f_hh) * 0.5
    top = jnp.stack([a, bb], axis=-1)
    bot = jnp.stack([cc, dd], axis=-1)
    return jnp.stack([top, bot], axis=2).reshape(b, c, h, w)


if __name__ == "__main__":
    # Small but lane-dense demo shape (c must be 1; see assert above).
    B, C, H, W = 2, 1, 32, 256
    ALPHA = 1.0

    key = jax.random.PRNGKey(0)
    x = jax.random.normal(key, (B, C, H, W), dtype=jnp.float32)

    # Deterministic parameter init matching WaveletFilterNet.__init__:
    # filter = cat([(a-0.1)*ones, a*ones, (a+0.1)*ones], dim=1), shape
    # (1, 3, H//2, W//2); leading batch-1 dim squeezed as glue.
    t_shape = (H // 2, W // 2)
    filt = jnp.stack([
        (ALPHA - 0.1) * jnp.ones(t_shape, jnp.float32),
        ALPHA * jnp.ones(t_shape, jnp.float32),
        (ALPHA + 0.1) * jnp.ones(t_shape, jnp.float32),
    ], axis=0)

    fn = jax.jit(wavelet_filter_net)
    out = jax.block_until_ready(fn(x, filt))

    ref = _reference(x, filt)
    assert out.shape == (B, C, H, W)
    assert out.dtype == jnp.float32
    assert jnp.allclose(out, ref, atol=1e-5, rtol=1e-5)

    print("KERNEL_OK")
</pallas_src>

<mosaic_0001>
module attributes {stable_mosaic.version = 11 : i64} {
  func.func @_wavelet_kernel(%arg0: i32, %arg1: i32, %arg2: memref<1x8x512xf32, #tpu.memory_space<vmem>>, %arg3: memref<8x768xf32, #tpu.memory_space<vmem>>, %arg4: memref<1x8x512xf32, #tpu.memory_space<vmem>>) attributes {dimension_semantics = [#tpu.dimension_semantics<parallel>, #tpu.dimension_semantics<parallel>], iteration_bounds = array<i64: 2, 2>, scalar_prefetch = 0 : i64, scratch_operands = 0 : i64, tpu.core_type = #tpu.core_type<tc>, window_params = [{transform_indices = @transform_0, window_bounds = array<i64: 1, 8, 512>}, {transform_indices = @transform_1, window_bounds = array<i64: 8, 768>}, {transform_indices = @transform_2, window_bounds = array<i64: 1, 8, 512>}]} {
    %c0 = arith.constant 0 : index
    %c0_0 = arith.constant 0 : index
    %c0_1 = arith.constant 0 : index
    %0 = vector.load %arg2[%c0, %c0_0, %c0_1] : memref<1x8x512xf32, #tpu.memory_space<vmem>>, vector<1x8x256xf32>
    %1 = vector.shape_cast %0 : vector<1x8x256xf32> to vector<8x256xf32>
    %c0_2 = arith.constant 0 : index
    %c0_3 = arith.constant 0 : index
    %c256 = arith.constant 256 : index
    %2 = vector.load %arg2[%c0_2, %c0_3, %c256] : memref<1x8x512xf32, #tpu.memory_space<vmem>>, vector<1x8x256xf32>
    %3 = vector.shape_cast %2 : vector<1x8x256xf32> to vector<8x256xf32>
    %4 = tpu.iota {dimensions = array<i32: 1>} : vector<1x256xi32>
    %c1_i32 = arith.constant 1 : i32
    %5 = vector.broadcast %c1_i32 : i32 to vector<1x256xi32>
    %6 = arith.andi %4, %5 : vector<1x256xi32>
    %c0_i32 = arith.constant 0 : i32
    %7 = vector.broadcast %c0_i32 : i32 to vector<1x256xi32>
    %8 = arith.cmpi eq, %6, %7 : vector<1x256xi32>
    %c255_i32 = arith.constant 255 : i32
    %9 = tpu.dynamic_rotate %1 by %c255_i32 dim 1 : vector<8x256xf32>, i32 -> vector<8x256xf32>
    %c1_i32_4 = arith.constant 1 : i32
    %10 = tpu.dynamic_rotate %1 by %c1_i32_4 dim 1 : vector<8x256xf32>, i32 -> vector<8x256xf32>
    %11 = vector.shape_cast %8 : vector<1x256xi1> to vector<1x256xi1>
    %12 = vector.broadcast %11 : vector<1x256xi1> to vector<8x256xi1>
    %13 = arith.select %12, %9, %10 : vector<8x256xi1>, vector<8x256xf32>
    %c255_i32_5 = arith.constant 255 : i32
    %14 = tpu.dynamic_rotate %3 by %c255_i32_5 dim 1 : vector<8x256xf32>, i32 -> vector<8x256xf32>
    %c1_i32_6 = arith.constant 1 : i32
    %15 = tpu.dynamic_rotate %3 by %c1_i32_6 dim 1 : vector<8x256xf32>, i32 -> vector<8x256xf32>
    %16 = vector.shape_cast %8 : vector<1x256xi1> to vector<1x256xi1>
    %17 = vector.broadcast %16 : vector<1x256xi1> to vector<8x256xi1>
    %18 = arith.select %17, %14, %15 : vector<8x256xi1>, vector<8x256xf32>
    %c0_7 = arith.constant 0 : index
    %c0_8 = arith.constant 0 : index
    %19 = vector.load %arg3[%c0_7, %c0_8] : memref<8x768xf32, #tpu.memory_space<vmem>>, vector<8x256xf32>
    %c0_9 = arith.constant 0 : index
    %c256_10 = arith.constant 256 : index
    %20 = vector.load %arg3[%c0_9, %c256_10] : memref<8x768xf32, #tpu.memory_space<vmem>>, vector<8x256xf32>
    %c0_11 = arith.constant 0 : index
    %c512 = arith.constant 512 : index
    %21 = vector.load %arg3[%c0_11, %c512] : memref<8x768xf32, #tpu.memory_space<vmem>>, vector<8x256xf32>
    %cst = arith.constant 1.000000e+00 : f32
    %22 = vector.broadcast %cst : f32 to vector<8x256xf32>
    %23 = arith.subf %22, %19 : vector<8x256xf32>
    %24 = arith.subf %23, %20 : vector<8x256xf32>
    %25 = arith.subf %24, %21 : vector<8x256xf32>
    %26 = arith.mulf %19, %1 : vector<8x256xf32>
    %27 = arith.mulf %20, %13 : vector<8x256xf32>
    %28 = arith.addf %26, %27 : vector<8x256xf32>
    %29 = arith.mulf %21, %3 : vector<8x256xf32>
    %30 = arith.addf %28, %29 : vector<8x256xf32>
    %31 = arith.mulf %25, %18 : vector<8x256xf32>
    %32 = arith.addf %30, %31 : vector<8x256xf32>
    %c0_12 = arith.constant 0 : index
    %c0_13 = arith.constant 0 : index
    %c0_14 = arith.constant 0 : index
    %33 = vector.load %arg4[%c0_12, %c0_13, %c0_14] : memref<1x8x512xf32, #tpu.memory_space<vmem>>, vector<1x8x256xf32>
    %34 = vector.shape_cast %33 : vector<1x8x256xf32> to vector<8x256xf32>
    %35 = vector.shape_cast %32 : vector<8x256xf32> to vector<1x8x256xf32>
    tpu.vector_store %arg4[%c0_12, %c0_13, %c0_14], %35 {strides = array<i32>} : memref<1x8x512xf32, #tpu.memory_space<vmem>>, vector<1x8x256xf32>,
    %36 = arith.mulf %25, %1 : vector<8x256xf32>
    %37 = arith.mulf %21, %13 : vector<8x256xf32>
    %38 = arith.addf %36, %37 : vector<8x256xf32>
    %39 = arith.mulf %20, %3 : vector<8x256xf32>
    %40 = arith.addf %38, %39 : vector<8x256xf32>
    %41 = arith.mulf %19, %18 : vector<8x256xf32>
    %42 = arith.addf %40, %41 : vector<8x256xf32>
    %c0_15 = arith.constant 0 : index
    %c0_16 = arith.constant 0 : index
    %c256_17 = arith.constant 256 : index
    %43 = vector.load %arg4[%c0_15, %c0_16, %c256_17] : memref<1x8x512xf32, #tpu.memory_space<vmem>>, vector<1x8x256xf32>
    %44 = vector.shape_cast %43 : vector<1x8x256xf32> to vector<8x256xf32>
    %45 = vector.shape_cast %42 : vector<8x256xf32> to vector<1x8x256xf32>
    tpu.vector_store %arg4[%c0_15, %c0_16, %c256_17], %45 {strides = array<i32>} : memref<1x8x512xf32, #tpu.memory_space<vmem>>, vector<1x8x256xf32>,
    return
  }
  func.func @transform_0(%arg0: i32, %arg1: i32) -> (i32, i32, i32) {
    %c0_i32 = arith.constant 0 : i32
    %c0_i32_0 = arith.constant 0 : i32
    return %arg1, %arg0, %c0_i32 : i32, i32, i32
  }
  func.func @transform_1(%arg0: i32, %arg1: i32) -> (i32, i32) {
    %c0_i32 = arith.constant 0 : i32
    %c0_i32_0 = arith.constant 0 : i32
    return %arg0, %c0_i32 : i32, i32
  }
  func.func @transform_2(%arg0: i32, %arg1: i32) -> (i32, i32, i32) {
    %c0_i32 = arith.constant 0 : i32
    %c0_i32_0 = arith.constant 0 : i32
    return %arg1, %arg0, %c0_i32 : i32, i32, i32
  }
}

</mosaic_0001>

<bundles_post_ra>
// kernel: wavelet_filter_net.1
= control target key start
LH: loop header
LB: loop body
LE: loop exit
PB: predicated region body
PF: predicated region fallthrough
CT: control target
= control target key end

     0   :  { %s510_s9 = smov 0   ;;  %s512_s10 = smov 0   ;;  %s605_s0 = inlined_call_operand.vmem [shape: f32[2,16,512], index: 0, kind: input, shape index: {}]   ;;  %s606_s1 = inlined_call_operand.vmem [shape: f32[16,768], index: 1, kind: input, shape index: {}]   ;;  %s607_s2 = inlined_call_operand.vmem [shape: f32[2,16,512], index: 2, kind: output, shape index: {}]  }
   0x1   :  { %s514_s11 = smov 0   ;;  %s516_s12 = smov 0  }
   0x2   :  { %s518_s13 = smov 0  }
   0x3 LB: > { %s21_s14 = sadd.s32 1, %s483_s11  ;;  %s24_s15 = sadd.s32 1, %s487_s12  ;;  %s491_s13 = sphi %s518_s13, %s12_s13   ;;  %s487_s12 = sphi %s516_s12, %s615_s12   ;;  %s483_s11 = sphi %s514_s11, %s614_s11   ;;  %s479_s10 = sphi %s512_s10, %s613_s10   ;;  %s475_s9 = sphi %s510_s9, %s612_s9  }
   0x4   : > { %p22_p0 = scmp.ge.s32.totalorder %s21_s14, 2  ;;  %p400_p1 = scmp.ge.s32.totalorder %s491_s13, 1 }
   0x5   : > { %p142_p2 = scmp.lt.s32.totalorder %s491_s13, 5 }
   0x6   : > { %s617_s14 = smov (%p22_p0, %s21_s14), 0  ;;  %s619_s15 = smov (!%p22_p0, %s24_s15), %s487_s12 }
   0x7   : > { %p143_p3 = pnand %p400_p1, %p142_p2  ;;  %p26_p4 = scmp.ge.s32.totalorder %s619_s15, 2 }
   0x8   : > { %p177_p5 = scmp.lt.s32.totalorder (!%p143_p3), %s475_s9, 1  ;;  %p179_p6 = scmp.lt.s32.totalorder (!%p143_p3), %s479_s10, 1 }
   0x9   : > { %s621_s15 = smov (%p26_p4, %s619_s15), 0  ;;  %146 = sbr.rel (%p143_p3) target bundleno = 156 (0x9c), region = 28 }
   0xa   : > { %s493_s27 = smov (!%p143_p3), 1   ;;  %s494_s28 = smov (!%p143_p3), 127  }
   0xe   : > { %s623_s9 = smov (!%p177_p5, %s475_s9), 1  ;;  %s625_s10 = smov (!%p179_p6, %s479_s10), 1  ;;  %v204_v24 = vlaneseq }
   0xf   : > { %s402_s16 = sshll.u32 %s623_s9, 3  ;;  %s401_s17 = sshll.u32 %s625_s10, 2 }
  0x10   : > { %s410_s18 = smul.u32 48, %s625_s10  ;;  %s540_s19 = sadd.s32 %s402_s16, %s401_s17  ;;  %v205_v25 = vand.u32 127, %v204_v24 }
  0x11   : > { %s403_s20 = sshll.u32 %s540_s19, 3 }
  0x12   : > { %s190_s23 = scalar_lea.vmem %s606_s1, %s410_s18  ;;  %s185_s26 = scalar_lea.vmem %s605_s0, %s403_s20  ;;  %v206_v26 = vadd.s32 128, %v205_v25  ;;  %v207_v27 = vand.u32 1, %v205_v25  ;;  %vm222_vm0 = vcmp.lt.s32.totalorder %v205_v25, 1  ;;  %vm215_vm1 = vcmp.lt.s32.totalorder %v205_v25, 127 }
  0x13   : > { %v551_v0 = vld [vmem:[%s190_s23] sm:$0xff]  ;;  %v553_v1 = vld [vmem:[%s190_s23 + $0x8] sm:$0xff]  ;;  %v247_v2 = vld [vmem:[%s190_s23 + $0x10] sm:$0xff]  ;;  %s199_s3 = scalar_lea.vmem %s607_s2, %s403_s20 }
  0x14   : > { %v200_v3 = vld [vmem:[%s185_s26] sm:$0xff]  ;;  %v201_v4 = vld [vmem:[%s185_s26 + $0x8] sm:$0xff]  ;;  %v203_v5 = vld [vmem:[%s185_s26 + $0x18] sm:$0xff]  ;;  %v251_v6 = vsub.f32 1.0, %v551_v0  ;;  %v252_v7 = vsub.f32 1.0, %v553_v1  ;;  %v208_v28 = vand.u32 1, %v206_v26 }
  0x15   : > { %218 = vrot.lane.b32.xlu1 %v200_v3, %s493_s27  ;;  %211 = vrot.lane.b32.xlu0 %v200_v3, %s494_s28  ;;  %v202_v8 = vld [vmem:[%s185_s26 + $0x10] sm:$0xff]  ;;  %v248_v9 = vld [vmem:[%s190_s23 + $0x18] sm:$0xff]  ;;  %v258_v10 = vmul.f32 %v553_v1, %v201_v4  ;;  %v257_v11 = vmul.f32 %v551_v0, %v200_v3  ;;  %vm559_vm2 = vcmp.eq.s32.totalorder %v207_v27, 0 }
  0x16   : > { %v249_v12 = vld [vmem:[%s190_s23 + $0x20] sm:$0xff]  ;;  %v250_v13 = vld [vmem:[%s190_s23 + $0x28] sm:$0xff]  ;;  %v253_v14 = vsub.f32 %v251_v6, %v247_v2  ;;  %v254_v15 = vsub.f32 %v252_v7, %v248_v9  ;;  %v279_v16 = vmul.f32 %v247_v2, %v202_v8  ;;  %v280_v17 = vmul.f32 %v248_v9, %v203_v5 }
  0x17   : > { %v263_v18 = vmul.f32 %v249_v12, %v202_v8  ;;  %v264_v19 = vmul.f32 %v250_v13, %v203_v5  ;;  %vm563_vm3 = vcmp.eq.s32.totalorder %v208_v28, 0 }
  0x18   : > { %v255_v20 = vsub.f32 %v253_v14, %v249_v12  ;;  %v256_v21 = vsub.f32 %v254_v15, %v250_v13 }
  0x19   : > { %220 = vrot.lane.b32.xlu1 %v201_v4, %s493_s27  ;;  %213 = vrot.lane.b32.xlu0 %v201_v4, %s494_s28 }
  0x1a   : > { %v274_v22 = vmul.f32 %v256_v21, %v201_v4  ;;  %v273_v23 = vmul.f32 %v255_v20, %v200_v3 }
  0x1d   : > { %233 = vrot.lane.b32.xlu1 %v203_v5, %s494_s28  ;;  %231 = vrot.lane.b32.xlu0 %v202_v8, %s494_s28 }
  0x21   : > { %239 = vrot.lane.b32.xlu1 %v203_v5, %s493_s27  ;;  %237 = vrot.lane.b32.xlu0 %v202_v8, %s493_s27 }
  0x87   : > { %v219_v29 = vpop.permute.xlu1 %218  ;;  %v212_v30 = vpop.permute.xlu0 %211 }
  0x8b   : > { %v221_v33 = vpop.permute.xlu1 %220  ;;  %v214_v34 = vpop.permute.xlu0 %213 }
  0x8c   : > { %v223_v35 = vsel %vm222_vm0, %v219_v29, %v221_v33  ;;  %v224_v36 = vsel %vm222_vm0, %v221_v33, %v219_v29  ;;  %v216_v37 = vsel %vm215_vm1, %v212_v30, %v214_v34  ;;  %v217_v38 = vsel %vm215_vm1, %v214_v34, %v212_v30 }
  0x8d   : > { %v229_v39 = vsel %vm559_vm2, %v216_v37, %v224_v36  ;;  %v230_v40 = vsel %vm563_vm3, %v217_v38, %v223_v35 }
  0x8e   : > { %v259_v41 = vmul.f32 %v247_v2, %v229_v39  ;;  %v260_v42 = vmul.f32 %v248_v9, %v230_v40  ;;  %v275_v43 = vmul.f32 %v249_v12, %v229_v39  ;;  %v276_v44 = vmul.f32 %v250_v13, %v230_v40 }
  0x8f   : > { %v234_v45 = vpop.permute.xlu1 %233  ;;  %v232_v46 = vpop.permute.xlu0 %231 }
  0x90   : > { %v261_v47 = vadd.f32 %v259_v41, %v257_v11  ;;  %v262_v48 = vadd.f32 %v260_v42, %v258_v10  ;;  %v277_v49 = vadd.f32 %v275_v43, %v273_v23  ;;  %v278_v50 = vadd.f32 %v276_v44, %v274_v22 }
  0x91   : > { %v235_v57 = vsel %vm215_vm1, %v232_v46, %v234_v45  ;;  %v236_v58 = vsel %vm215_vm1, %v234_v45, %v232_v46 }
  0x92   : > { %v266_v51 = vadd.f32 %v264_v19, %v262_v48  ;;  %v282_v52 = vadd.f32 %v280_v17, %v278_v50  ;;  %v265_v53 = vadd.f32 %v263_v18, %v261_v47  ;;  %v281_v54 = vadd.f32 %v279_v16, %v277_v49 }
  0x93   : > { %v240_v55 = vpop.permute.xlu1 %239  ;;  %v238_v56 = vpop.permute.xlu0 %237 }
  0x94   : > { %v241_v59 = vsel %vm222_vm0, %v238_v56, %v240_v55  ;;  %v242_v60 = vsel %vm222_vm0, %v240_v55, %v238_v56 }
  0x95   : > { %v243_v61 = vsel %vm559_vm2, %v235_v57, %v242_v60  ;;  %v244_v62 = vsel %vm563_vm3, %v236_v58, %v241_v59 }
  0x96   : > { %v267_v63 = vmul.f32 %v255_v20, %v243_v61  ;;  %v268_v2 = vmul.f32 %v256_v21, %v244_v62  ;;  %v283_v3 = vmul.f32 %v551_v0, %v243_v61  ;;  %v284_v4 = vmul.f32 %v553_v1, %v244_v62 }
  0x98   : > { %v269_v5 = vadd.f32 %v267_v63, %v265_v53  ;;  %v270_v6 = vadd.f32 %v268_v2, %v266_v51  ;;  %v285_v7 = vadd.f32 %v283_v3, %v281_v54  ;;  %v286_v8 = vadd.f32 %v284_v4, %v282_v52 }
  0x9a   : > { %271 = vst [vmem:[%s199_s3] sm:$0xff] %v269_v5  ;;  %272 = vst [vmem:[%s199_s3 + $0x8] sm:$0xff] %v270_v6 }
  0x9b   : > { %287 = vst [vmem:[%s199_s3 + $0x10] sm:$0xff] %v285_v7  ;;  %288 = vst [vmem:[%s199_s3 + $0x18] sm:$0xff] %v286_v8 }
  0x9c PF: > { %s12_s13 = sadd.s32 1, %s491_s13   ;;  %s612_s9 = smov %s483_s11 }
  0x9d   : > { %p9_p7 = scmp.ge.s32.totalorder %s12_s13, 6   ;;  %s613_s10 = smov %s487_s12 }
  0x9e   : > { %s614_s11 = smov %s617_s14  ;;  %s615_s12 = smov %s621_s15 }
  0x9f   :  { %11 = sbr.rel (!%p9_p7) target bundleno = 3 (0x3), region = 61 }

</bundles_post_ra>
